<compile_context>
chip_gen: v7x
topology: tpu7x:2x2x1
jax: 0.10.0
libtpu: 0.0.40
codegen_flags: <defaults>
</compile_context>

<pallas_src>
import jax
import jax.numpy as jnp
from jax import lax
from jax.experimental import pallas as pl
from jax.experimental.pallas import tpu as pltpu


def _ensemble_kernel(x_ref, w_ref, b_ref, o_ref):
    """Single invocation: ensemble-mean the linear heads, then one matmul."""
    n = w_ref.shape[0]            # static ensemble size
    inv_n = 1.0 / n               # compile-time scalar constant

    # Ensemble mean of the heads: (N, K, D) -> (K, D), (N, K) -> (K).
    # N-1 elementwise adds on the VPU + one scalar-constant multiply.
    w_mean = jnp.sum(w_ref[...], axis=0) * inv_n
    b_mean = jnp.sum(b_ref[...], axis=0) * inv_n

    # One MXU matmul contracting on the lane-dense D axis:
    # (B, D) x (K, D) -> (B, K), f32 accumulation.
    logits = lax.dot_general(
        x_ref[...],
        w_mean,
        dimension_numbers=(((1,), (1,)), ((), ())),
        preferred_element_type=jnp.float32,
    )
    o_ref[...] = (logits + b_mean[None, :]).astype(o_ref.dtype)


def ensemble_net_forward(x_nchw, weights_nkd, biases_nk):
    """x_nchw     : (B, C, H, W) float32
       weights_nkd: (N, K, D) float32, D = C*H*W, K = 10 classes
       biases_nk  : (N, K) float32
       returns    : (B, K) float32 — mean of per-member logits."""
    B = x_nchw.shape[0]
    N, K, D = weights_nkd.shape
    x_flat = x_nchw.reshape(B, D).astype(jnp.float32)

    return pl.pallas_call(
        _ensemble_kernel,
        out_shape=jax.ShapeDtypeStruct((B, K), jnp.float32),
        # No grid: whole (small) operands live in VMEM for one kernel step.
        in_specs=[
            pl.BlockSpec(memory_space=pltpu.MemorySpace.VMEM),  # x_flat
            pl.BlockSpec(memory_space=pltpu.MemorySpace.VMEM),  # weights
            pl.BlockSpec(memory_space=pltpu.MemorySpace.VMEM),  # biases
        ],
        out_specs=pl.BlockSpec(memory_space=pltpu.MemorySpace.VMEM),
    )(x_flat, weights_nkd, biases_nk)


def _reference_forward(x_nchw, weights_nkd, biases_nk):
    """Pure-JAX reference matching the PyTorch forward (per-member logits,
    then mean over the ensemble)."""
    B = x_nchw.shape[0]
    x_flat = x_nchw.reshape(B, -1)
    logits = jnp.einsum("bd,nkd->nbk", x_flat, weights_nkd) + biases_nk[:, None, :]
    return logits.mean(axis=0)


if __name__ == "__main__":
    # Small shapes consistent with the module: batch=2, channels=4, spatial=16,
    # ensemble of 3 models, 10 output classes.
    B, C, H, W = 2, 4, 16, 16
    NUM_MODELS, NUM_CLASSES = 3, 10
    D = C * H * W

    key = jax.random.PRNGKey(0)
    kx, kw, kb = jax.random.split(key, 3)
    x = jax.random.normal(kx, (B, C, H, W), dtype=jnp.float32)
    # nn.Linear-style (out_features, in_features) layout, stacked over members:
    weights = (jax.random.normal(kw, (NUM_MODELS, NUM_CLASSES, D),
                                 dtype=jnp.float32) * 0.02)
    biases = (jax.random.normal(kb, (NUM_MODELS, NUM_CLASSES),
                                dtype=jnp.float32) * 0.1)

    out = ensemble_net_forward(x, weights, biases)
    out = jax.block_until_ready(out)

    ref = _reference_forward(x, weights, biases)
    assert out.shape == (B, NUM_CLASSES), out.shape
    assert jnp.allclose(out, ref, atol=1e-4, rtol=1e-4), (
        f"max abs diff {jnp.max(jnp.abs(out - ref))}"
    )
    print("KERNEL_OK")
</pallas_src>

<mosaic_0001>
module attributes {stable_mosaic.version = 11 : i64} {
  func.func @_ensemble_kernel(%arg0: memref<2x1024xf32, #tpu.memory_space<vmem>>, %arg1: memref<3x10x1024xf32, #tpu.memory_space<vmem>>, %arg2: memref<3x10xf32, #tpu.memory_space<vmem>>, %arg3: memref<2x10xf32, #tpu.memory_space<vmem>>) attributes {dimension_semantics = [], scalar_prefetch = 0 : i64, scratch_operands = 0 : i64, tpu.core_type = #tpu.core_type<tc>} {
    %c0 = arith.constant 0 : index
    %c0_0 = arith.constant 0 : index
    %c0_1 = arith.constant 0 : index
    %0 = vector.load %arg1[%c0, %c0_0, %c0_1] : memref<3x10x1024xf32, #tpu.memory_space<vmem>>, vector<3x10x1024xf32>
    %cst = arith.constant dense<0.000000e+00> : vector<10x1024xf32>
    %1 = vector.multi_reduction <add>, %0, %cst [0] : vector<3x10x1024xf32> to vector<10x1024xf32>
    %cst_2 = arith.constant 0.333333343 : f32
    %2 = vector.broadcast %cst_2 : f32 to vector<10x1024xf32>
    %3 = arith.mulf %1, %2 : vector<10x1024xf32>
    %c0_3 = arith.constant 0 : index
    %c0_4 = arith.constant 0 : index
    %4 = vector.load %arg2[%c0_3, %c0_4] : memref<3x10xf32, #tpu.memory_space<vmem>>, vector<3x10xf32>
    %cst_5 = arith.constant dense<0.000000e+00> : vector<10xf32>
    %5 = vector.multi_reduction <add>, %4, %cst_5 [0] : vector<3x10xf32> to vector<10xf32>
    %cst_6 = arith.constant 0.333333343 : f32
    %6 = vector.broadcast %cst_6 : f32 to vector<10xf32>
    %7 = arith.mulf %5, %6 : vector<10xf32>
    %c0_7 = arith.constant 0 : index
    %c0_8 = arith.constant 0 : index
    %8 = vector.load %arg0[%c0_7, %c0_8] : memref<2x1024xf32, #tpu.memory_space<vmem>>, vector<2x1024xf32>
    %cst_9 = arith.constant dense<0.000000e+00> : vector<2x10xf32>
    %9 = tpu.matmul %8, %3, %cst_9 {dimension_numbers = #tpu.dot_dimension_numbers<[1], [1], [0], [0], [0, 0, 1, 0], [], []>} : vector<2x1024xf32>, vector<10x1024xf32>, vector<2x10xf32> -> vector<2x10xf32>
    %10 = vector.shape_cast %7 : vector<10xf32> to vector<1x10xf32>
    %11 = vector.broadcast %10 : vector<1x10xf32> to vector<2x10xf32>
    %12 = arith.addf %9, %11 : vector<2x10xf32>
    %c0_10 = arith.constant 0 : index
    %c0_11 = arith.constant 0 : index
    %13 = vector.load %arg3[%c0_10, %c0_11] : memref<2x10xf32, #tpu.memory_space<vmem>>, vector<2x10xf32>
    tpu.vector_store %arg3[%c0_10, %c0_11], %12 {strides = array<i32>} : memref<2x10xf32, #tpu.memory_space<vmem>>, vector<2x10xf32>,
    return
  }
}

</mosaic_0001>

<bundles_post_ra>
// kernel: tpu_custom_call.1
= control target key start
LH: loop header
LB: loop body
LE: loop exit
PB: predicated region body
PF: predicated region fallthrough
CT: control target
= control target key end

     0   :  { %vm79_vm0 = vcmask 1041408   ;;  %v154_v37 = vlaneseq  ;;  %s765_s0 = inlined_call_operand.vmem [shape: f32[2,1024], index: 0, kind: input, shape index: {}]   ;;  %s766_s1 = inlined_call_operand.vmem [shape: f32[3,10,1024], index: 1, kind: input, shape index: {}]   ;;  %s767_s2 = inlined_call_operand.vmem [shape: f32[3,10], index: 2, kind: input, shape index: {}]   ;;  %s768_s3 = inlined_call_operand.hbm [shape: f32[2,10], index: 3, kind: output, shape index: {}]  }
   0x1   :  { %v16_v0 = vld [vmem:[%s766_s1 + $0x8] sm:$0xff]  ;;  %v15_v22 = vld [vmem:[%s766_s1] sm:$0xff]  ;;  %v18_v55 = vld [vmem:[%s766_s1 + $0x18] sm:$0xff] }
   0x2   :  { %v24_v1 = vld [vmem:[%s766_s1 + $0x48] sm:$0x3]  ;;  %v23_v23 = vld [vmem:[%s766_s1 + $0x40] sm:$0x3]  ;;  %v26_v61 = vld [vmem:[%s766_s1 + $0x58] sm:$0x3] }
   0x3   :  { %v32_v2 = vld [vmem:[%s766_s1 + $0x88] sm:$0xff]  ;;  %v85_v7 = vsel %vm79_vm0, %v24_v1, 0.0  ;;  %v31_v24 = vld [vmem:[%s766_s1 + $0x80] sm:$0xff]  ;;  %v80_v34 = vsel %vm79_vm0, %v23_v23, 0.0  ;;  %v34_v62 = vld [vmem:[%s766_s1 + $0x98] sm:$0xff] }
   0x4   :  { %v40_v3 = vld [vmem:[%s766_s1 + $0xc8] sm:$0x3]  ;;  %v65_v6 = vadd.f32 %v32_v2, %v16_v0  ;;  %v39_v29 = vld [vmem:[%s766_s1 + $0xc0] sm:$0x3]  ;;  %v63_v33 = vadd.f32 %v31_v24, %v15_v22  ;;  %v42_v2 = vld [vmem:[%s766_s1 + $0xd8] sm:$0x3] }
   0x5   :  { %v48_v4 = vld [vmem:[%s766_s1 + $0x108] sm:$0xff]  ;;  %v86_v8 = vsel %vm79_vm0, %v40_v3, 0.0  ;;  %v47_v30 = vld [vmem:[%s766_s1 + $0x100] sm:$0xff]  ;;  %v81_v35 = vsel %vm79_vm0, %v39_v29, 0.0  ;;  %v54_v24 = vld [vmem:[%s766_s1 + $0x138] sm:$0xff] }
   0x6   :  { %v56_v5 = vld [vmem:[%s766_s1 + $0x148] sm:$0x3]  ;;  %v66_v13 = vadd.f32 %v65_v6, %v48_v4  ;;  %v87_v14 = vadd.f32 %v86_v8, %v85_v7  ;;  %v19_v31 = vld [vmem:[%s766_s1 + $0x20] sm:$0xff]  ;;  %v82_v41 = vadd.f32 %v81_v35, %v80_v34  ;;  %v64_v44 = vadd.f32 %v63_v33, %v47_v30  ;;  %v50_v8 = vld [vmem:[%s766_s1 + $0x118] sm:$0xff] }
   0x7   :  { %v88_v9 = vsel %vm79_vm0, %v56_v5, 0.0  ;;  %v20_v10 = vld [vmem:[%s766_s1 + $0x28] sm:$0xff]  ;;  %v55_v32 = vld [vmem:[%s766_s1 + $0x140] sm:$0x3]  ;;  %v538_v5 = vmov 1983009808  }
   0x8   :  { %v28_v11 = vld [vmem:[%s766_s1 + $0x68] sm:$0x3]  ;;  %v89_v25 = vadd.f32 %v88_v9, %v87_v14  ;;  %v121_v26 = vmul.f32 0.33333334, %v66_v13  ;;  %v27_v36 = vld [vmem:[%s766_s1 + $0x60] sm:$0x3]  ;;  %v152_v6 = vunpack.c.l.s4 %v538_v5 }
   0x9   :  { %v36_v12 = vld [vmem:[%s766_s1 + $0xa8] sm:$0xff]  ;;  %v105_v19 = vsel %vm79_vm0, %v28_v11, 0.0  ;;  %v35_v42 = vld [vmem:[%s766_s1 + $0xa0] sm:$0xff]  ;;  %v83_v45 = vsel %vm79_vm0, %v55_v32, 0.0  ;;  %v100_v49 = vsel %vm79_vm0, %v27_v36, 0.0  ;;  %v155_v7 = vshrl.u32 %v154_v37, 7 }
   0xa   :  { %v44_v15 = vld [vmem:[%s766_s1 + $0xe8] sm:$0x3]  ;;  %v73_v18 = vadd.f32 %v36_v12, %v20_v10  ;;  %v129_v38 = vmul.f32 0.33333334, %v89_v25  ;;  %v51_v43 = vld [vmem:[%s766_s1 + $0x120] sm:$0xff]  ;;  %v71_v48 = vadd.f32 %v35_v42, %v19_v31  ;;  %v84_v52 = vadd.f32 %v83_v45, %v82_v41  ;;  %v22_v14 = vld [vmem:[%s766_s1 + $0x38] sm:$0xff] }
   0xb   :  { %v52_v16 = vld [vmem:[%s766_s1 + $0x128] sm:$0xff]  ;;  %v106_v20 = vsel %vm79_vm0, %v44_v15, 0.0  ;;  %v43_v46 = vld [vmem:[%s766_s1 + $0xe0] sm:$0x3]  ;;  %v120_v56 = vmul.f32 0.33333334, %v64_v44  ;;  %v69_v12 = vadd.f32 %v34_v62, %v18_v55 }
   0xc   :  { %v60_v17 = vld [vmem:[%s766_s1 + $0x168] sm:$0x3]  ;;  %v74_v27 = vadd.f32 %v73_v18, %v52_v16  ;;  %v107_v28 = vadd.f32 %v106_v20, %v105_v19  ;;  %v59_v47 = vld [vmem:[%s766_s1 + $0x160] sm:$0x3]  ;;  %v488_v50 = vpack.c.bf16 %v129_v38, %v121_v26  ;;  %v101_v53 = vsel %vm79_vm0, %v43_v46, 0.0  ;;  %v38_v16 = vld [vmem:[%s766_s1 + $0xb8] sm:$0xff] }
   0xd   :  { %v108_v21 = vsel %vm79_vm0, %v60_v17, 0.0  ;;  %v646_v54 = vld [vmem:[%s765_s0] sm:$0xff]  ;;  %v72_v57 = vadd.f32 %v71_v48, %v51_v43  ;;  %v102_v58 = vadd.f32 %v101_v53, %v100_v49  ;;  %v103_v59 = vsel %vm79_vm0, %v59_v47, 0.0  ;;  %v655_v60 = vld [vmem:[%s765_s0 + $0x8] sm:$0xff]  ;;  %v58_v9 = vld [vmem:[%s766_s1 + $0x158] sm:$0x3] }
   0xe   :  { %v109_v39 = vadd.f32 %v108_v21, %v107_v28  ;;  %v125_v40 = vmul.f32 0.33333334, %v74_v27  ;;  %489 = vmatprep.subr.bf16.mxu1 %v488_v50  ;;  %v128_v0 = vmul.f32 0.33333334, %v84_v52  ;;  %v150_v1 = vcombine.high %v646_v54, %v646_v54  ;;  %v30_v15 = vld [vmem:[%s766_s1 + $0x78] sm:$0x3] }
   0xf   :  { %v104_v3 = vadd.f32 %v103_v59, %v102_v58  ;;  %v124_v4 = vmul.f32 0.33333334, %v72_v57  ;;  %v167_v11 = vcombine.high %v655_v60, %v655_v60  ;;  %v95_v13 = vsel %vm79_vm0, %v26_v61, 0.0  ;;  %v46_v21 = vld [vmem:[%s766_s1 + $0xf8] sm:$0x3]  ;;  %v17_v28 = vld [vmem:[%s766_s1 + $0x10] sm:$0xff] }
  0x10   :  { %v133_v51 = vmul.f32 0.33333334, %v109_v39  ;;  %v490_v10 = vpack.c.bf16 %v128_v0, %v120_v56  ;;  %v153_v18 = vunpack.c.0.s8 %v152_v6  ;;  %v96_v19 = vsel %vm79_vm0, %v42_v2, 0.0  ;;  %v62_v25 = vld [vmem:[%s766_s1 + $0x178] sm:$0x3]  ;;  %v33_v34 = vld [vmem:[%s766_s1 + $0x90] sm:$0xff] }
  0x11   :  { %v132_v17 = vmul.f32 0.33333334, %v104_v3  ;;  %v98_v20 = vsel %vm79_vm0, %v58_v9, 0.0  ;;  %v70_v22 = vadd.f32 %v69_v12, %v50_v8  ;;  %v97_v23 = vadd.f32 %v96_v19, %v95_v13  ;;  %v25_v33 = vld [vmem:[%s766_s1 + $0x50] sm:$0x3] }
  0x12   :  { %v496_v63 = vpack.c.bf16 %v133_v51, %v125_v40  ;;  %491 = vmatpush1.bf16.xpose.msra.mxu1 %v490_v10  ;;  %v77_v26 = vadd.f32 %v38_v16, %v22_v14  ;;  %v115_v27 = vsel %vm79_vm0, %v30_v15, 0.0  ;;  %v156_v30 = vsub.s32 %v153_v18, %v155_v7  ;;  %v49_v35 = vld [vmem:[%s766_s1 + $0x110] sm:$0xff] }
  0x13   :  { %v498_v29 = vpack.c.bf16 %v132_v17, %v124_v4  ;;  %v116_v31 = vsel %vm79_vm0, %v46_v21, 0.0  ;;  %v118_v32 = vsel %vm79_vm0, %v62_v25, 0.0  ;;  %v99_v36 = vadd.f32 %v98_v20, %v97_v23  ;;  %v41_v40 = vld [vmem:[%s766_s1 + $0xd0] sm:$0x3] }
  0x14   :  { %497 = vmatprep.subr.bf16.mxu0 %v496_v63  ;;  %v123_v37 = vmul.f32 0.33333334, %v70_v22  ;;  %v78_v38 = vadd.f32 %v77_v26, %v54_v24  ;;  %v117_v39 = vadd.f32 %v116_v31, %v115_v27  ;;  %v57_v41 = vld [vmem:[%s766_s1 + $0x150] sm:$0x3]  ;;  %v157_v42 = vrot.slane %v646_v54, %v156_v30 }
  0x15   :  { %499 = vmatpush1.bf16.xpose.msra.mxu0 %v498_v29  ;;  %v174_v43 = vrot.slane %v655_v60, %v156_v30  ;;  %v67_v44 = vadd.f32 %v33_v34, %v17_v28  ;;  %v90_v45 = vsel %vm79_vm0, %v25_v33, 0.0  ;;  %v21_v46 = vld [vmem:[%s766_s1 + $0x30] sm:$0xff]  ;;  %v131_v49 = vmul.f32 0.33333334, %v99_v36 }
  0x16   :  { %v29_v47 = vld [vmem:[%s766_s1 + $0x70] sm:$0x3]  ;;  %v119_v50 = vadd.f32 %v118_v32, %v117_v39  ;;  %v127_v51 = vmul.f32 0.33333334, %v78_v38  ;;  %v91_v52 = vsel %vm79_vm0, %v41_v40, 0.0  ;;  %v165_v53 = vcombine.high %v157_v42, %v157_v42 }
  0x17   :  { %v37_v48 = vld [vmem:[%s766_s1 + $0xb0] sm:$0xff]  ;;  %v182_v55 = vcombine.high %v174_v43, %v174_v43  ;;  %v68_v56 = vadd.f32 %v67_v44, %v49_v35  ;;  %v92_v57 = vadd.f32 %v91_v52, %v90_v45  ;;  %v492_v62 = vpack.c.bf16 %v131_v49, %v123_v37 }
  0x18   :  { %v45_v58 = vld [vmem:[%s766_s1 + $0xf0] sm:$0x3]  ;;  %v135_v63 = vmul.f32 0.33333334, %v119_v50  ;;  %v93_v0 = vsel %vm79_vm0, %v57_v41, 0.0  ;;  %v75_v2 = vadd.f32 %v37_v48, %v21_v46 }
  0x19   :  { %v53_v59 = vld [vmem:[%s766_s1 + $0x130] sm:$0xff] }
  0x1a   :  { %v61_v61 = vld [vmem:[%s766_s1 + $0x170] sm:$0x3] }
  0x1b   :  { %8 = vsyncpa [#allocation3], 0  ;;  %256 = vmatprep.mubr.f32.mxu1 %v165_v53  ;;  %396 = vmatprep.mubr.f32.mxu0 %v182_v55  ;;  %v94_v3 = vadd.f32 %v93_v0, %v92_v57  ;;  %v122_v4 = vmul.f32 0.33333334, %v68_v56  ;;  %v110_v5 = vsel %vm79_vm0, %v29_v47, 0.0  ;;  %v111_v6 = vsel %vm79_vm0, %v45_v58, 0.0 }
  0x1c   :  { %257 = vmatmul.mubr.f32.vlgmr.msra.gmra.mrb[0].mxu1 %v157_v42  ;;  %493 = vmatprep.subr.bf16.mxu1 %v492_v62  ;;  %v500_v7 = vpack.c.bf16 %v135_v63, %v127_v51  ;;  %v76_v8 = vadd.f32 %v75_v2, %v53_v59  ;;  %v112_v9 = vadd.f32 %v111_v6, %v110_v5  ;;  %v113_v10 = vsel %vm79_vm0, %v61_v61, 0.0  ;;  %v136_v54 = vld [vmem:[%s767_s2] sm:$0x7]  ;;  %s539_s30 = smov [#allocation2]  }
  0x1d   :  { %v130_v12 = vmul.f32 0.33333334, %v94_v3  ;;  %v164_v13 = vrot.slane %v150_v1, %v156_v30  ;;  %v181_v14 = vrot.slane %v167_v11, %v156_v30  ;;  %397 = vmatmul.mubr.f32.vlgmr.msra.gmra.mrb[0].mxu0 %v174_v43  ;;  %vm137_vm1 = vcmask 75776   ;;  %s480_s4 = sshll.u32 %s539_s30, 4  ;;  %s481_s4 = int_to_ptr.vmem [resolvable:$true] %s480_s4 }
  0x1e   :  { %501 = vmatprep.subr.bf16.mxu0 %v500_v7  ;;  %v114_v15 = vadd.f32 %v113_v10, %v112_v9  ;;  %v126_v16 = vmul.f32 0.33333334, %v76_v8  ;;  %v138_v60 = vsel %vm137_vm1, %v136_v54, 0.0  ;;  %vm472_vm2 = vcmask 74752   ;;  %s514_s2 = scalar_lea.vmem %s481_s4, 32  ;;  %p519_p1 = scmp.lt.s32.totalorder %s481_s4, %s481_s4 }
  0x1f   :  { %v494_v17 = vpack.c.bf16 %v130_v12, %v122_v4  ;;  %v166_v18 = vcombine.high %v164_v13, %v164_v13  ;;  %v183_v19 = vcombine.high %v181_v14, %v181_v14  ;;  %v139_v1 = vrot.slane %v138_v60, 4  ;;  %p515_p0 = scmp.ne.s32.totalorder %s481_s4, %s514_s2  ;;  %p520_p2 = scmp.lt.s32.totalorder %s514_s2, %s514_s2 }
  0x20   :  { %v134_v20 = vmul.f32 0.33333334, %v114_v15 }
  0x21   :  { %495 = vmatpush1.bf16.xpose.msra.mxu1 %v494_v17  ;;  %326 = vmatprep.mubr.f32.mxu1 %v166_v18  ;;  %v140_v11 = vadd.f32 %v139_v1, %v138_v60  ;;  %p521_p3 = por %p520_p2, %p519_p1 }
  0x22   :  { %v502_v21 = vpack.c.bf16 %v134_v20, %v126_v16  ;;  %466 = vmatprep.mubr.f32.mxu0 %v183_v19 }
  0x23   :  { %v141_v22 = vrot.slane %v140_v11, 2  ;;  %p522_p4 = pnand %p521_p3, %p515_p0 }
  0x24   :  { %503 = vmatpush1.bf16.xpose.msra.mxu0 %v502_v21 }
  0x25   :  { %v142_v23 = vadd.f32 %v141_v22, %v140_v11 }
  0x27   :  { %v143_v24 = vrot.slane %v142_v23, 1 }
  0x28   :  { %327 = vmatmul.mubr.f32.vlgmr.msra.gmra.mrb[0].mxu1 %v164_v13 }
  0x29   :  { %v144_v25 = vadd.f32 %v143_v24, %v142_v23 }
  0x2b   :  { %467 = vmatmul.mubr.f32.vlgmr.msra.gmra.mrb[0].mxu0 %v181_v14  ;;  %v145_v26 = vmul.f32 0.33333334, %v144_v25 }
  0xfb   :  { %v328_v27 = vpop.f32.mrb[0].mxu1 }
  0xfc   :  { %v504_v28 = vadd.f32 %v328_v27, %v145_v26  ;;  %v330_v29 = vpop.f32.mrb[1].mxu1 }
  0xfe   :  { %v468_v30 = vpop.f32.mrb[0].mxu0 }
  0xff   :  { %v505_v31 = vadd.f32 %v504_v28, %v468_v30  ;;  %v470_v32 = vpop.f32.mrb[1].mxu0 }
 0x101   :  { %473 = vst.msk [vmem:[#allocation2] sm:$0x3] %vm472_vm2, %v505_v31 }
 0x102   :  { %525 = shalt.err (!%p522_p4)
}
 0x103   :  { %s526_s7 = scalar_lea.hbm %s768_s3, 32 }
 0x104   :  { %p527_p5 = scmp.ne.s32.totalorder %s768_s3, %s526_s7  ;;  %p530_p6 = scmp.lt.u32.totalorder %s526_s7, %s768_s3 }
 0x106   :  { %p532_p7 = pnand %p530_p6, %p527_p5 }
 0x108   :  { %535 = shalt.err (!%p532_p7)
}
 0x109   :  { %483 = dma.vmem_to_hbm [thread:$0]  %s481_s4, 32, %s768_s3, [#allocation3]  }
 0x10a   :  { %536 = dma.done.wait [#allocation3], 32  }
 0x10b   :  { %537 = vsyncadd [#allocation3], 4294967264 }
 0x10c   :  { %487 = vsyncpa [#allocation3], 1 }

</bundles_post_ra>
